<compile_context>
chip_gen: v5e
topology: v5e:2x2
jax: 0.10.0
libtpu: 0.0.40
codegen_flags: <defaults>
</compile_context>

<pallas_src>
import functools

import jax
import jax.numpy as jnp
from jax.experimental import pallas as pl
from jax.experimental.pallas import tpu as pltpu


# ----------------------------- Pallas kernel ------------------------------- #
def _cond_resblock_kernel(
    x_ref,      # (Bb, T+pad, Cres) f32   causally left-padded x, channels-last
    cond_ref,   # (Bb, T, Ccond)    bf16  conditioning, channels-last
    wdil_ref,   # (K, Cres, Cgate)  bf16  dilated conv taps
    wcond_ref,  # (Ccond, Cgate)    bf16  condition 1x1
    wf_ref,     # (Cgate, Cres)     bf16  filter 1x1
    bf_ref,     # (1, Cres)         f32   (b1 folded in)
    wg_ref,     # (Cgate, Cres)     bf16  gate 1x1
    bg_ref,     # (1, Cres)         f32   (b1 folded in)
    wskip_ref,  # (Cres, Cskip)     bf16  BN-folded skip 1x1
    bskip_ref,  # (1, Cskip)        f32
    wres_ref,   # (Cres, Cres)      bf16  BN-folded residual 1x1
    bres_ref,   # (1, Cres)         f32
    res_ref,    # (Bb, T, Cres)     f32   output: residual
    skip_ref,   # (Bb, T, Cskip)    f32   output: skip
    *, K, dilation,
):
    Bb, T, Ccond = cond_ref.shape
    Cres = x_ref.shape[-1]
    Cskip = skip_ref.shape[-1]
    pad = (K - 1) * dilation
    M = Bb * T

    # dilated causal conv + conditioning 1x1: K+1 small MXU dots accumulated in
    # f32 (no (M, K*Cres+Ccond) im2col slab is ever built).
    comb = jnp.dot(cond_ref[...].reshape(M, Ccond), wcond_ref[...],
                   preferred_element_type=jnp.float32)
    for k in range(K):
        tap = x_ref[:, k * dilation:k * dilation + T, :]          # static slice
        comb = comb + jnp.dot(tap.astype(jnp.bfloat16).reshape(M, Cres),
                              wdil_ref[k], preferred_element_type=jnp.float32)
    comb = comb.astype(jnp.bfloat16)          # conv bias b1 folded into bf/bg

    # gated activation unit (filter / gate 1x1 convs), tile-aligned outputs
    f = jnp.dot(comb, wf_ref[...], preferred_element_type=jnp.float32) + bf_ref[...]
    g = jnp.dot(comb, wg_ref[...], preferred_element_type=jnp.float32) + bg_ref[...]
    gated = (jnp.tanh(f) * jax.nn.sigmoid(g)).astype(jnp.bfloat16)

    # BatchNorm(eval) folded into skip/residual weights; Dropout(eval)=identity
    skip = (jnp.dot(gated, wskip_ref[...], preferred_element_type=jnp.float32)
            + bskip_ref[...])
    res = (jnp.dot(gated, wres_ref[...], preferred_element_type=jnp.float32)
           + bres_ref[...])
    res = res + x_ref[:, pad:, :].reshape(M, Cres)   # identity path stays f32

    res_ref[...] = res.reshape(Bb, T, Cres).astype(res_ref.dtype)
    skip_ref[...] = skip.reshape(Bb, T, Cskip).astype(skip_ref.dtype)


# --------------------------- wrapper-side helpers --------------------------- #
def _full_spec(shape):
    zeros = (0,) * len(shape)
    return pl.BlockSpec(shape, lambda g, _z=zeros: _z)


def _pick_batch_block(B, rows_per_batch, row_cap=2048):
    """Largest divisor Bb of B with Bb*rows <= row_cap, keeping >=2 grid steps
    whenever B > 1 (so both v7x TensorCores get work)."""
    best = 1
    for cand in range(1, B + 1):
        if B % cand:
            continue
        if cand * rows_per_batch > row_cap:
            continue
        if B > 1 and B // cand < 2:
            continue
        best = max(best, cand)
    return best


def _prepare(x_ncl, cond_ncl, params, *, kernel_size, dilation):
    """Fold/fuse all weights and build channels-last activations (f32 math)."""
    B, Cres, T = x_ncl.shape
    Ccond = cond_ncl.shape[1]
    K, d = kernel_size, dilation
    pad = (K - 1) * d
    Cgate = params["w_dilated"].shape[0]
    Cskip = params["w_skip"].shape[0]
    f32, bf16 = jnp.float32, jnp.bfloat16

    # activations -> channels-last; x gets its causal left pad here (this is
    # the ONLY copy of x the kernel reads: taps and identity come from it).
    x_nlc = jnp.transpose(x_ncl, (0, 2, 1)).astype(f32)           # (B, T, Cres)
    x_pad = jnp.pad(x_nlc, ((0, 0), (pad, 0), (0, 0)))            # (B, T+pad, Cres)
    cond_nlc = jnp.transpose(cond_ncl, (0, 2, 1)).astype(bf16)    # (B, T, Ccond)

    # dilated conv taps (K, Cres, Cgate) and conditioning 1x1 (Ccond, Cgate)
    wdil = jnp.transpose(params["w_dilated"], (2, 1, 0))          # (K, Cres, Cgate)
    wcond = params["w_cond"][:, :, 0].T                           # (Ccond, Cgate)
    b1 = params["b_dilated"] + params["b_cond"]                   # folded below

    # filter / gate 1x1 with b1 folded into their biases (bias commutes through
    # the linear filter/gate matmuls).
    wf = params["w_filter"][:, :, 0].T                            # (Cgate, Cres)
    wg = params["w_gate"][:, :, 0].T
    bf = (params["b_filter"] + b1 @ wf).reshape(1, Cres)
    bg = (params["b_gate"] + b1 @ wg).reshape(1, Cres)

    # skip / residual 1x1 with eval-BatchNorm folded in
    eps = 1e-5
    scale = params["bn_gamma"] / jnp.sqrt(params["bn_var"] + eps)
    shift = params["bn_beta"] - params["bn_mean"] * scale
    wskip = scale[:, None] * params["w_skip"][:, :, 0].T          # (Cres, Cskip)
    wres = scale[:, None] * params["w_residual"][:, :, 0].T       # (Cres, Cres)
    bskip = (shift @ params["w_skip"][:, :, 0].T + params["b_skip"]).reshape(1, Cskip)
    bres = (shift @ params["w_residual"][:, :, 0].T + params["b_residual"]).reshape(1, Cres)

    return dict(
        x_pad=x_pad, cond=cond_nlc,
        wdil=wdil.astype(bf16), wcond=wcond.astype(bf16),
        wf=wf.astype(bf16), bf=bf.astype(f32),
        wg=wg.astype(bf16), bg=bg.astype(f32),
        wskip=wskip.astype(bf16), bskip=bskip.astype(f32),
        wres=wres.astype(bf16), bres=bres.astype(f32),
        B=B, T=T, pad=pad, Cres=Cres, Cgate=Cgate, Cskip=Cskip, Ccond=Ccond,
    )


# ------------------------------ main wrapper -------------------------------- #
def conditional_residual_block(x_ncl, cond_ncl, params, *, kernel_size, dilation,
                               row_cap=2048):
    """x_ncl: (B, Cres, T), cond_ncl: (B, Ccond, T). Returns (residual, skip) in NCL."""
    p = _prepare(x_ncl, cond_ncl, params, kernel_size=kernel_size, dilation=dilation)
    B, T, pad = p["B"], p["T"], p["pad"]
    Cres, Cgate, Cskip, Ccond = p["Cres"], p["Cgate"], p["Cskip"], p["Ccond"]
    Tpad = T + pad
    K = kernel_size

    Bb = _pick_batch_block(B, Tpad, row_cap)
    grid = (B // Bb,)

    kernel = functools.partial(_cond_resblock_kernel, K=K, dilation=dilation)

    mm_flops = K * Cres * Cgate + Ccond * Cgate + 2 * Cgate * Cres + Cres * (Cskip + Cres)
    flops = 2 * B * T * mm_flops
    transcendentals = 2 * B * T * Cres
    bytes_accessed = (B * Tpad * Cres * 4 + B * T * Ccond * 2          # x + cond
                      + B * T * (Cres + Cskip) * 4                     # outputs
                      + mm_flops * 2                                   # weights (bf16)
                      + (4 * Cres + Cskip) * 4)                        # biases

    res, skip = pl.pallas_call(
        kernel,
        out_shape=(jax.ShapeDtypeStruct((B, T, Cres), jnp.float32),
                   jax.ShapeDtypeStruct((B, T, Cskip), jnp.float32)),
        grid_spec=pltpu.PrefetchScalarGridSpec(
            num_scalar_prefetch=0,
            grid=grid,
            in_specs=[
                pl.BlockSpec((Bb, Tpad, Cres), lambda g: (g, 0, 0)),
                pl.BlockSpec((Bb, T, Ccond), lambda g: (g, 0, 0)),
                _full_spec((K, Cres, Cgate)),
                _full_spec((Ccond, Cgate)),
                _full_spec((Cgate, Cres)), _full_spec((1, Cres)),
                _full_spec((Cgate, Cres)), _full_spec((1, Cres)),
                _full_spec((Cres, Cskip)), _full_spec((1, Cskip)),
                _full_spec((Cres, Cres)), _full_spec((1, Cres)),
            ],
            out_specs=[
                pl.BlockSpec((Bb, T, Cres), lambda g: (g, 0, 0)),
                pl.BlockSpec((Bb, T, Cskip), lambda g: (g, 0, 0)),
            ],
        ),
        compiler_params=pltpu.CompilerParams(
            dimension_semantics=("parallel",),
            vmem_limit_bytes=32 * 1024 * 1024,
        ),
        cost_estimate=pl.CostEstimate(flops=flops, transcendentals=transcendentals,
                                      bytes_accessed=bytes_accessed),
    )(p["x_pad"], p["cond"], p["wdil"], p["wcond"], p["wf"], p["bf"],
      p["wg"], p["bg"], p["wskip"], p["bskip"], p["wres"], p["bres"])

    # back to the PyTorch NCL layout (consumers chaining blocks should keep NLC)
    return jnp.transpose(res, (0, 2, 1)), jnp.transpose(skip, (0, 2, 1))


# --------------------- references for correctness checks -------------------- #
def matched_reference(x_ncl, cond_ncl, params, *, kernel_size, dilation):
    """Plain-JAX replica of the kernel's exact bf16/f32 mixed-precision math."""
    p = _prepare(x_ncl, cond_ncl, params, kernel_size=kernel_size, dilation=dilation)
    B, T, pad, Cres, Ccond = p["B"], p["T"], p["pad"], p["Cres"], p["Ccond"]
    d = dilation
    M = B * T
    comb = jnp.dot(p["cond"].reshape(M, Ccond), p["wcond"],
                   preferred_element_type=jnp.float32)
    for k in range(kernel_size):
        tap = p["x_pad"][:, k * d:k * d + T, :]
        comb = comb + jnp.dot(tap.astype(jnp.bfloat16).reshape(M, Cres),
                              p["wdil"][k], preferred_element_type=jnp.float32)
    comb = comb.astype(jnp.bfloat16)
    f = jnp.dot(comb, p["wf"], preferred_element_type=jnp.float32) + p["bf"]
    g = jnp.dot(comb, p["wg"], preferred_element_type=jnp.float32) + p["bg"]
    gated = (jnp.tanh(f) * jax.nn.sigmoid(g)).astype(jnp.bfloat16)
    skip = jnp.dot(gated, p["wskip"], preferred_element_type=jnp.float32) + p["bskip"]
    res = jnp.dot(gated, p["wres"], preferred_element_type=jnp.float32) + p["bres"]
    res = res + p["x_pad"][:, pad:, :].reshape(M, Cres)
    res = res.reshape(B, T, Cres)
    skip = skip.reshape(B, T, -1)
    return jnp.transpose(res, (0, 2, 1)), jnp.transpose(skip, (0, 2, 1))


def reference_f32(x_ncl, cond_ncl, params, *, kernel_size, dilation):
    """Pure-f32 PyTorch-equivalent forward (eval-mode BN, dropout=identity)."""
    K, d = kernel_size, dilation
    pad = (K - 1) * d
    B, Cres, T = x_ncl.shape
    xp = jnp.pad(x_ncl, ((0, 0), (0, 0), (pad, 0)))
    dil = jnp.zeros((B, params["w_dilated"].shape[0], T), jnp.float32)
    for k in range(K):
        dil += jnp.einsum("oik,bit->bot", params["w_dilated"][:, :, k:k + 1],
                          xp[:, :, k * d: k * d + T])
    dil += params["b_dilated"][None, :, None]
    cnd = jnp.einsum("oi,bit->bot", params["w_cond"][:, :, 0], cond_ncl) \
        + params["b_cond"][None, :, None]
    comb = dil + cnd
    filt = jnp.tanh(jnp.einsum("oi,bit->bot", params["w_filter"][:, :, 0], comb)
                    + params["b_filter"][None, :, None])
    gate = jax.nn.sigmoid(jnp.einsum("oi,bit->bot", params["w_gate"][:, :, 0], comb)
                          + params["b_gate"][None, :, None])
    gated = filt * gate
    eps = 1e-5
    scale = params["bn_gamma"] / jnp.sqrt(params["bn_var"] + eps)
    shift = params["bn_beta"] - params["bn_mean"] * scale
    gated = gated * scale[None, :, None] + shift[None, :, None]
    skip = jnp.einsum("oi,bit->bot", params["w_skip"][:, :, 0], gated) \
        + params["b_skip"][None, :, None]
    res = jnp.einsum("oi,bit->bot", params["w_residual"][:, :, 0], gated) \
        + params["b_residual"][None, :, None] + x_ncl
    return res, skip


# --------------------------------- main ------------------------------------ #
if __name__ == "__main__":
    B, T = 2, 32
    Cres, Cgate, Cskip, Ccond = 16, 32, 16, 8
    K, dilation = 3, 2

    key = jax.random.PRNGKey(0)
    ks = jax.random.split(key, 16)

    def rnd(k, shape, scale=0.1):
        return (scale * jax.random.normal(k, shape)).astype(jnp.float32)

    params = {
        "w_dilated": rnd(ks[0], (Cgate, Cres, K)),
        "b_dilated": rnd(ks[1], (Cgate,)),
        "w_cond": rnd(ks[2], (Cgate, Ccond, 1)),
        "b_cond": rnd(ks[3], (Cgate,)),
        "w_filter": rnd(ks[4], (Cres, Cgate, 1)),
        "b_filter": rnd(ks[5], (Cres,)),
        "w_gate": rnd(ks[6], (Cres, Cgate, 1)),
        "b_gate": rnd(ks[7], (Cres,)),
        "w_skip": rnd(ks[8], (Cskip, Cres, 1)),
        "b_skip": rnd(ks[9], (Cskip,)),
        "w_residual": rnd(ks[10], (Cres, Cres, 1)),
        "b_residual": rnd(ks[11], (Cres,)),
        "bn_gamma": jnp.ones((Cres,), jnp.float32),
        "bn_beta": jnp.zeros((Cres,), jnp.float32),
        "bn_mean": jnp.zeros((Cres,), jnp.float32),
        "bn_var": jnp.ones((Cres,), jnp.float32),
    }

    x = rnd(ks[12], (B, Cres, T), scale=1.0)
    cond = rnd(ks[13], (B, Ccond, T), scale=1.0)

    res, skip = conditional_residual_block(x, cond, params,
                                           kernel_size=K, dilation=dilation)
    jax.block_until_ready((res, skip))
    assert res.shape == (B, Cres, T) and skip.shape == (B, Cskip, T)

    # exact-numerics check (same bf16-input / f32-accumulate math as the kernel)
    res_m, skip_m = matched_reference(x, cond, params, kernel_size=K, dilation=dilation)
    assert jnp.allclose(res, res_m, atol=5e-3, rtol=5e-3), "residual mismatch (matched)"
    assert jnp.allclose(skip, skip_m, atol=5e-3, rtol=5e-3), "skip mismatch (matched)"

    # semantic check vs the pure-f32 PyTorch-equivalent forward (bf16 tolerance)
    res_f, skip_f = reference_f32(x, cond, params, kernel_size=K, dilation=dilation)
    assert jnp.allclose(res, res_f, atol=2e-2, rtol=2e-2), "residual mismatch (f32 ref)"
    assert jnp.allclose(skip, skip_f, atol=2e-2, rtol=2e-2), "skip mismatch (f32 ref)"

    print("KERNEL_OK")
</pallas_src>

<mosaic_0001>
module attributes {stable_mosaic.version = 11 : i64} {
  func.func @_cond_resblock_kernel(%arg0: i32, %arg1: memref<1x36x16xf32, #tpu.memory_space<vmem>>, %arg2: memref<1x32x8xbf16, #tpu.memory_space<vmem>>, %arg3: memref<3x16x32xbf16, #tpu.memory_space<vmem>>, %arg4: memref<8x32xbf16, #tpu.memory_space<vmem>>, %arg5: memref<32x16xbf16, #tpu.memory_space<vmem>>, %arg6: memref<1x16xf32, #tpu.memory_space<vmem>>, %arg7: memref<32x16xbf16, #tpu.memory_space<vmem>>, %arg8: memref<1x16xf32, #tpu.memory_space<vmem>>, %arg9: memref<16x16xbf16, #tpu.memory_space<vmem>>, %arg10: memref<1x16xf32, #tpu.memory_space<vmem>>, %arg11: memref<16x16xbf16, #tpu.memory_space<vmem>>, %arg12: memref<1x16xf32, #tpu.memory_space<vmem>>, %arg13: memref<1x32x16xf32, #tpu.memory_space<vmem>>, %arg14: memref<1x32x16xf32, #tpu.memory_space<vmem>>) attributes {dimension_semantics = [#tpu.dimension_semantics<parallel>], iteration_bounds = array<i64: 2>, scalar_prefetch = 0 : i64, scratch_operands = 0 : i64, tpu.core_type = #tpu.core_type<tc>, window_params = [{transform_indices = @transform_0, window_bounds = array<i64: 1, 36, 16>}, {transform_indices = @transform_1, window_bounds = array<i64: 1, 32, 8>}, {pipeline_mode = #tpu.pipeline_mode<synchronous>, transform_indices = @transform_2, window_bounds = array<i64: 3, 16, 32>}, {pipeline_mode = #tpu.pipeline_mode<synchronous>, transform_indices = @transform_3, window_bounds = array<i64: 8, 32>}, {pipeline_mode = #tpu.pipeline_mode<synchronous>, transform_indices = @transform_4, window_bounds = array<i64: 32, 16>}, {pipeline_mode = #tpu.pipeline_mode<synchronous>, transform_indices = @transform_5, window_bounds = array<i64: 1, 16>}, {pipeline_mode = #tpu.pipeline_mode<synchronous>, transform_indices = @transform_6, window_bounds = array<i64: 32, 16>}, {pipeline_mode = #tpu.pipeline_mode<synchronous>, transform_indices = @transform_7, window_bounds = array<i64: 1, 16>}, {pipeline_mode = #tpu.pipeline_mode<synchronous>, transform_indices = @transform_8, window_bounds = array<i64: 16, 16>}, {pipeline_mode = #tpu.pipeline_mode<synchronous>, transform_indices = @transform_9, window_bounds = array<i64: 1, 16>}, {pipeline_mode = #tpu.pipeline_mode<synchronous>, transform_indices = @transform_10, window_bounds = array<i64: 16, 16>}, {pipeline_mode = #tpu.pipeline_mode<synchronous>, transform_indices = @transform_11, window_bounds = array<i64: 1, 16>}, {transform_indices = @transform_12, window_bounds = array<i64: 1, 32, 16>}, {transform_indices = @transform_13, window_bounds = array<i64: 1, 32, 16>}]} {
    %c0 = arith.constant 0 : index
    %c0_0 = arith.constant 0 : index
    %c0_1 = arith.constant 0 : index
    %0 = vector.load %arg2[%c0, %c0_0, %c0_1] : memref<1x32x8xbf16, #tpu.memory_space<vmem>>, vector<1x32x8xbf16>
    %1 = vector.shape_cast %0 : vector<1x32x8xbf16> to vector<32x8xbf16>
    %c0_2 = arith.constant 0 : index
    %c0_3 = arith.constant 0 : index
    %2 = vector.load %arg4[%c0_2, %c0_3] : memref<8x32xbf16, #tpu.memory_space<vmem>>, vector<8x32xbf16>
    %cst = arith.constant dense<0.000000e+00> : vector<32x32xf32>
    %3 = tpu.matmul %1, %2, %cst {dimension_numbers = #tpu.dot_dimension_numbers<[1], [0], [0], [1], [0, 0, 1, 1], [], []>} : vector<32x8xbf16>, vector<8x32xbf16>, vector<32x32xf32> -> vector<32x32xf32>
    %c0_4 = arith.constant 0 : index
    %c0_5 = arith.constant 0 : index
    %c0_6 = arith.constant 0 : index
    %4 = vector.load %arg1[%c0_4, %c0_5, %c0_6] : memref<1x36x16xf32, #tpu.memory_space<vmem>>, vector<1x32x16xf32>
    %5 = arith.truncf %4 : vector<1x32x16xf32> to vector<1x32x16xbf16>
    %6 = vector.shape_cast %5 : vector<1x32x16xbf16> to vector<32x16xbf16>
    %c0_7 = arith.constant 0 : index
    %c0_8 = arith.constant 0 : index
    %c0_9 = arith.constant 0 : index
    %7 = vector.load %arg3[%c0_7, %c0_8, %c0_9] : memref<3x16x32xbf16, #tpu.memory_space<vmem>>, vector<1x16x32xbf16>
    %8 = vector.shape_cast %7 : vector<1x16x32xbf16> to vector<16x32xbf16>
    %cst_10 = arith.constant dense<0.000000e+00> : vector<32x32xf32>
    %9 = tpu.matmul %6, %8, %cst_10 {dimension_numbers = #tpu.dot_dimension_numbers<[1], [0], [0], [1], [0, 0, 1, 1], [], []>} : vector<32x16xbf16>, vector<16x32xbf16>, vector<32x32xf32> -> vector<32x32xf32>
    %10 = arith.addf %3, %9 : vector<32x32xf32>
    %c0_11 = arith.constant 0 : index
    %c2 = arith.constant 2 : index
    %c0_12 = arith.constant 0 : index
    %11 = vector.load %arg1[%c0_11, %c2, %c0_12] : memref<1x36x16xf32, #tpu.memory_space<vmem>>, vector<1x32x16xf32>
    %12 = arith.truncf %11 : vector<1x32x16xf32> to vector<1x32x16xbf16>
    %13 = vector.shape_cast %12 : vector<1x32x16xbf16> to vector<32x16xbf16>
    %c1 = arith.constant 1 : index
    %c0_13 = arith.constant 0 : index
    %c0_14 = arith.constant 0 : index
    %14 = vector.load %arg3[%c1, %c0_13, %c0_14] : memref<3x16x32xbf16, #tpu.memory_space<vmem>>, vector<1x16x32xbf16>
    %15 = vector.shape_cast %14 : vector<1x16x32xbf16> to vector<16x32xbf16>
    %cst_15 = arith.constant dense<0.000000e+00> : vector<32x32xf32>
    %16 = tpu.matmul %13, %15, %cst_15 {dimension_numbers = #tpu.dot_dimension_numbers<[1], [0], [0], [1], [0, 0, 1, 1], [], []>} : vector<32x16xbf16>, vector<16x32xbf16>, vector<32x32xf32> -> vector<32x32xf32>
    %17 = arith.addf %10, %16 : vector<32x32xf32>
    %c0_16 = arith.constant 0 : index
    %c4 = arith.constant 4 : index
    %c0_17 = arith.constant 0 : index
    %18 = vector.load %arg1[%c0_16, %c4, %c0_17] : memref<1x36x16xf32, #tpu.memory_space<vmem>>, vector<1x32x16xf32>
    %19 = arith.truncf %18 : vector<1x32x16xf32> to vector<1x32x16xbf16>
    %20 = vector.shape_cast %19 : vector<1x32x16xbf16> to vector<32x16xbf16>
    %c2_18 = arith.constant 2 : index
    %c0_19 = arith.constant 0 : index
    %c0_20 = arith.constant 0 : index
    %21 = vector.load %arg3[%c2_18, %c0_19, %c0_20] : memref<3x16x32xbf16, #tpu.memory_space<vmem>>, vector<1x16x32xbf16>
    %22 = vector.shape_cast %21 : vector<1x16x32xbf16> to vector<16x32xbf16>
    %cst_21 = arith.constant dense<0.000000e+00> : vector<32x32xf32>
    %23 = tpu.matmul %20, %22, %cst_21 {dimension_numbers = #tpu.dot_dimension_numbers<[1], [0], [0], [1], [0, 0, 1, 1], [], []>} : vector<32x16xbf16>, vector<16x32xbf16>, vector<32x32xf32> -> vector<32x32xf32>
    %24 = arith.addf %17, %23 : vector<32x32xf32>
    %25 = arith.truncf %24 : vector<32x32xf32> to vector<32x32xbf16>
    %c0_22 = arith.constant 0 : index
    %c0_23 = arith.constant 0 : index
    %26 = vector.load %arg5[%c0_22, %c0_23] : memref<32x16xbf16, #tpu.memory_space<vmem>>, vector<32x16xbf16>
    %cst_24 = arith.constant dense<0.000000e+00> : vector<32x16xf32>
    %27 = tpu.matmul %25, %26, %cst_24 {dimension_numbers = #tpu.dot_dimension_numbers<[1], [0], [0], [1], [0, 0, 1, 1], [], []>} : vector<32x32xbf16>, vector<32x16xbf16>, vector<32x16xf32> -> vector<32x16xf32>
    %c0_25 = arith.constant 0 : index
    %c0_26 = arith.constant 0 : index
    %28 = vector.load %arg6[%c0_25, %c0_26] : memref<1x16xf32, #tpu.memory_space<vmem>>, vector<1x16xf32>
    %29 = vector.broadcast %28 : vector<1x16xf32> to vector<32x16xf32>
    %30 = arith.addf %27, %29 : vector<32x16xf32>
    %c0_27 = arith.constant 0 : index
    %c0_28 = arith.constant 0 : index
    %31 = vector.load %arg7[%c0_27, %c0_28] : memref<32x16xbf16, #tpu.memory_space<vmem>>, vector<32x16xbf16>
    %cst_29 = arith.constant dense<0.000000e+00> : vector<32x16xf32>
    %32 = tpu.matmul %25, %31, %cst_29 {dimension_numbers = #tpu.dot_dimension_numbers<[1], [0], [0], [1], [0, 0, 1, 1], [], []>} : vector<32x32xbf16>, vector<32x16xbf16>, vector<32x16xf32> -> vector<32x16xf32>
    %c0_30 = arith.constant 0 : index
    %c0_31 = arith.constant 0 : index
    %33 = vector.load %arg8[%c0_30, %c0_31] : memref<1x16xf32, #tpu.memory_space<vmem>>, vector<1x16xf32>
    %34 = vector.broadcast %33 : vector<1x16xf32> to vector<32x16xf32>
    %35 = arith.addf %32, %34 : vector<32x16xf32>
    %36 = math.tanh %30 : vector<32x16xf32>
    %37 = arith.negf %35 : vector<32x16xf32>
    %38 = math.exp %37 : vector<32x16xf32>
    %cst_32 = arith.constant 1.000000e+00 : f32
    %39 = vector.broadcast %cst_32 : f32 to vector<32x16xf32>
    %40 = arith.addf %39, %38 : vector<32x16xf32>
    %41 = arith.divf %39, %40 : vector<32x16xf32>
    %42 = arith.mulf %36, %41 : vector<32x16xf32>
    %43 = arith.truncf %42 : vector<32x16xf32> to vector<32x16xbf16>
    %c0_33 = arith.constant 0 : index
    %c0_34 = arith.constant 0 : index
    %44 = vector.load %arg9[%c0_33, %c0_34] : memref<16x16xbf16, #tpu.memory_space<vmem>>, vector<16x16xbf16>
    %cst_35 = arith.constant dense<0.000000e+00> : vector<32x16xf32>
    %45 = tpu.matmul %43, %44, %cst_35 {dimension_numbers = #tpu.dot_dimension_numbers<[1], [0], [0], [1], [0, 0, 1, 1], [], []>} : vector<32x16xbf16>, vector<16x16xbf16>, vector<32x16xf32> -> vector<32x16xf32>
    %c0_36 = arith.constant 0 : index
    %c0_37 = arith.constant 0 : index
    %46 = vector.load %arg10[%c0_36, %c0_37] : memref<1x16xf32, #tpu.memory_space<vmem>>, vector<1x16xf32>
    %47 = vector.broadcast %46 : vector<1x16xf32> to vector<32x16xf32>
    %48 = arith.addf %45, %47 : vector<32x16xf32>
    %c0_38 = arith.constant 0 : index
    %c0_39 = arith.constant 0 : index
    %49 = vector.load %arg11[%c0_38, %c0_39] : memref<16x16xbf16, #tpu.memory_space<vmem>>, vector<16x16xbf16>
    %cst_40 = arith.constant dense<0.000000e+00> : vector<32x16xf32>
    %50 = tpu.matmul %43, %49, %cst_40 {dimension_numbers = #tpu.dot_dimension_numbers<[1], [0], [0], [1], [0, 0, 1, 1], [], []>} : vector<32x16xbf16>, vector<16x16xbf16>, vector<32x16xf32> -> vector<32x16xf32>
    %c0_41 = arith.constant 0 : index
    %c0_42 = arith.constant 0 : index
    %51 = vector.load %arg12[%c0_41, %c0_42] : memref<1x16xf32, #tpu.memory_space<vmem>>, vector<1x16xf32>
    %52 = vector.broadcast %51 : vector<1x16xf32> to vector<32x16xf32>
    %53 = arith.addf %50, %52 : vector<32x16xf32>
    %c0_43 = arith.constant 0 : index
    %c4_44 = arith.constant 4 : index
    %c0_45 = arith.constant 0 : index
    %54 = vector.load %arg1[%c0_43, %c4_44, %c0_45] : memref<1x36x16xf32, #tpu.memory_space<vmem>>, vector<1x32x16xf32>
    %55 = vector.shape_cast %54 : vector<1x32x16xf32> to vector<32x16xf32>
    %56 = arith.addf %53, %55 : vector<32x16xf32>
    %57 = vector.shape_cast %56 : vector<32x16xf32> to vector<1x32x16xf32>
    %c0_46 = arith.constant 0 : index
    %c0_47 = arith.constant 0 : index
    %c0_48 = arith.constant 0 : index
    %58 = vector.load %arg13[%c0_46, %c0_47, %c0_48] : memref<1x32x16xf32, #tpu.memory_space<vmem>>, vector<1x32x16xf32>
    tpu.vector_store %arg13[%c0_46, %c0_47, %c0_48], %57 {strides = array<i32>} : memref<1x32x16xf32, #tpu.memory_space<vmem>>, vector<1x32x16xf32>,
    %59 = vector.shape_cast %48 : vector<32x16xf32> to vector<1x32x16xf32>
    %c0_49 = arith.constant 0 : index
    %c0_50 = arith.constant 0 : index
    %c0_51 = arith.constant 0 : index
    %60 = vector.load %arg14[%c0_49, %c0_50, %c0_51] : memref<1x32x16xf32, #tpu.memory_space<vmem>>, vector<1x32x16xf32>
    tpu.vector_store %arg14[%c0_49, %c0_50, %c0_51], %59 {strides = array<i32>} : memref<1x32x16xf32, #tpu.memory_space<vmem>>, vector<1x32x16xf32>,
    return
  }
  func.func @transform_0(%arg0: i32) -> (i32, i32, i32) {
    %c0_i32 = arith.constant 0 : i32
    %c0_i32_0 = arith.constant 0 : i32
    %c0_i32_1 = arith.constant 0 : i32
    return %arg0, %c0_i32, %c0_i32_0 : i32, i32, i32
  }
  func.func @transform_1(%arg0: i32) -> (i32, i32, i32) {
    %c0_i32 = arith.constant 0 : i32
    %c0_i32_0 = arith.constant 0 : i32
    %c0_i32_1 = arith.constant 0 : i32
    return %arg0, %c0_i32, %c0_i32_0 : i32, i32, i32
  }
  func.func @transform_2(%arg0: i32) -> (i32, i32, i32) {
    %c0_i32 = arith.constant 0 : i32
    %c0_i32_0 = arith.constant 0 : i32
    %c0_i32_1 = arith.constant 0 : i32
    %c0_i32_2 = arith.constant 0 : i32
    return %c0_i32, %c0_i32_0, %c0_i32_1 : i32, i32, i32
  }
  func.func @transform_3(%arg0: i32) -> (i32, i32) {
    %c0_i32 = arith.constant 0 : i32
    %c0_i32_0 = arith.constant 0 : i32
    %c0_i32_1 = arith.constant 0 : i32
    return %c0_i32, %c0_i32_0 : i32, i32
  }
  func.func @transform_4(%arg0: i32) -> (i32, i32) {
    %c0_i32 = arith.constant 0 : i32
    %c0_i32_0 = arith.constant 0 : i32
    %c0_i32_1 = arith.constant 0 : i32
    return %c0_i32, %c0_i32_0 : i32, i32
  }
  func.func @transform_5(%arg0: i32) -> (i32, i32) {
    %c0_i32 = arith.constant 0 : i32
    %c0_i32_0 = arith.constant 0 : i32
    %c0_i32_1 = arith.constant 0 : i32
    return %c0_i32, %c0_i32_0 : i32, i32
  }
  func.func @transform_6(%arg0: i32) -> (i32, i32) {
    %c0_i32 = arith.constant 0 : i32
    %c0_i32_0 = arith.constant 0 : i32
    %c0_i32_1 = arith.constant 0 : i32
    return %c0_i32, %c0_i32_0 : i32, i32
  }
  func.func @transform_7(%arg0: i32) -> (i32, i32) {
    %c0_i32 = arith.constant 0 : i32
    %c0_i32_0 = arith.constant 0 : i32
    %c0_i32_1 = arith.constant 0 : i32
    return %c0_i32, %c0_i32_0 : i32, i32
  }
  func.func @transform_8(%arg0: i32) -> (i32, i32) {
    %c0_i32 = arith.constant 0 : i32
    %c0_i32_0 = arith.constant 0 : i32
    %c0_i32_1 = arith.constant 0 : i32
    return %c0_i32, %c0_i32_0 : i32, i32
  }
  func.func @transform_9(%arg0: i32) -> (i32, i32) {
    %c0_i32 = arith.constant 0 : i32
    %c0_i32_0 = arith.constant 0 : i32
    %c0_i32_1 = arith.constant 0 : i32
    return %c0_i32, %c0_i32_0 : i32, i32
  }
  func.func @transform_10(%arg0: i32) -> (i32, i32) {
    %c0_i32 = arith.constant 0 : i32
    %c0_i32_0 = arith.constant 0 : i32
    %c0_i32_1 = arith.constant 0 : i32
    return %c0_i32, %c0_i32_0 : i32, i32
  }
  func.func @transform_11(%arg0: i32) -> (i32, i32) {
    %c0_i32 = arith.constant 0 : i32
    %c0_i32_0 = arith.constant 0 : i32
    %c0_i32_1 = arith.constant 0 : i32
    return %c0_i32, %c0_i32_0 : i32, i32
  }
  func.func @transform_12(%arg0: i32) -> (i32, i32, i32) {
    %c0_i32 = arith.constant 0 : i32
    %c0_i32_0 = arith.constant 0 : i32
    %c0_i32_1 = arith.constant 0 : i32
    return %arg0, %c0_i32, %c0_i32_0 : i32, i32, i32
  }
  func.func @transform_13(%arg0: i32) -> (i32, i32, i32) {
    %c0_i32 = arith.constant 0 : i32
    %c0_i32_0 = arith.constant 0 : i32
    %c0_i32_1 = arith.constant 0 : i32
    return %arg0, %c0_i32, %c0_i32_0 : i32, i32, i32
  }
}

</mosaic_0001>

<bundles_post_ra>
// kernel: tpu_custom_call.1
= control target key start
LH: loop header
LB: loop body
LE: loop exit
PB: predicated region body
PF: predicated region fallthrough
CT: control target
= control target key end

     0   :  { %s1248_s25 = smov 0   ;;  %s1387_s0 = inlined_call_operand.vmem [shape: f32[2,36,16], index: 0, kind: input, shape index: {}]   ;;  %s1388_s1 = inlined_call_operand.vmem [shape: bf16[2,32,8], index: 1, kind: input, shape index: {}]   ;;  %s1389_s2 = inlined_call_operand.vmem [shape: bf16[3,16,32], index: 2, kind: input, shape index: {}]   ;;  %s1390_s3 = inlined_call_operand.vmem [shape: bf16[8,32], index: 3, kind: input, shape index: {}]   ;;  %s1391_s4 = inlined_call_operand.vmem [shape: bf16[32,16], index: 4, kind: input, shape index: {}]   ;;  %s1392_s5 = inlined_call_operand.vmem [shape: f32[1,16], index: 5, kind: input, shape index: {}]   ;;  %s1393_s6 = inlined_call_operand.vmem [shape: bf16[32,16], index: 6, kind: input, shape index: {}]   ;;  %s1394_s7 = inlined_call_operand.vmem [shape: f32[1,16], index: 7, kind: input, shape index: {}]   ;;  %s1395_s8 = inlined_call_operand.vmem [shape: bf16[16,16], index: 8, kind: input, shape index: {}]   ;;  %s1396_s9 = inlined_call_operand.vmem [shape: f32[1,16], index: 9, kind: input, shape index: {}]   ;;  %s1397_s10 = inlined_call_operand.vmem [shape: bf16[16,16], index: 10, kind: input, shape index: {}]   ;;  %s1398_s11 = inlined_call_operand.vmem [shape: f32[1,16], index: 11, kind: input, shape index: {}]   ;;  %s1399_s12 = inlined_call_operand.vmem [shape: f32[2,32,16], index: 12, kind: output, shape index: {0}]   ;;  %s1400_s13 = inlined_call_operand.vmem [shape: f32[2,32,16], index: 13, kind: output, shape index: {1}]  }
   0x1 LB: > { %s1037_s26 = sadd.s32 4294967295, %s1176_s25   ;;  %p1041_p0 = scmp.ge.s32.totalorder %s1176_s25, 1  ;;  %s1176_s25 = sphi %s1248_s25, %s24_s25  }
   0x2   : > { %p400_p1 = scmp.lt.s32.totalorder %s1176_s25, 3 }
   0x4   : > { %p401_p2 = pnand %p1041_p0, %p400_p1 }
   0x5   : > { %p454_p3 = scmp.lt.s32.totalorder (!%p401_p2), %s1037_s26, 1 }
   0x6   : > { %404 = sbr.rel (%p401_p2) target bundleno = 498 (0x1f2), region = 68 }
   0xb   : > { %v479_v0 = vld [vmem:[%s1390_s3] sm:$0xf]  ;;  %vm549_vm0 = vcmask 1043456   ;;  %v1125_v3 = vld [vmem:[%s1389_s2 + $0x8] sm:$0xff]  ;;  %v1126_v4 = vld [vmem:[%s1389_s2 + $0x10] sm:$0xff]  ;;  %s1402_s26 = smov (!%p454_p3, %s1037_s26), 1 }
   0xc   : > { %v1124_v1 = vld [vmem:[%s1389_s2] sm:$0xff]  ;;  %v551_v2 = vsel %vm549_vm0, %v479_v0, 0  ;;  %v1130_v5 = vld [vmem:[%s1393_s6 + $0x8] sm:$0xff]  ;;  %612 = vmatpush.bf16.msra.mxu2 %v1125_v3  ;;  %668 = vmatpush.bf16.msra.mxu3 %v1126_v4  ;;  %s1133_s20 = smul.u32 40, %s1402_s26  ;;  %s1119_s21 = sshll.u32 %s1402_s26, 4  ;;  %vm542_vm1 = vcmask 64512  }
   0xd   : > { %560 = vmatpush.bf16.msra.mxu1 %v551_v2  ;;  %520 = vmatpush.bf16.msra.mxu0 %v1124_v1  ;;  %s1278_s24 = scalar_lea.vmem %s1388_s1, %s1119_s21  ;;  %vm506_vm2 = vcmask 130048   ;;  %v1129_v50 = vld [vmem:[%s1393_s6] sm:$0xff]  ;;  %v1128_v51 = vld [vmem:[%s1391_s4 + $0x8] sm:$0xff]  ;;  %vm706_vm3 = vcmask 261120  }
   0xe   : > { %s1283_s29 = scalar_lea.vmem %s1387_s0, %s1133_s20  ;;  %v1122_v6 = vld [vmem:[%s1278_s24] sm:$0xff]  ;;  %v1123_v40 = vld [vmem:[%s1278_s24 + $0x8] sm:$0xff] }
   0xf   : > { %v480_v7 = vld [vmem:[%s1283_s29] sm:$0xff]  ;;  %v481_v8 = vld [vmem:[%s1283_s29 + $0x8] sm:$0xff]  ;;  %v482_v28 = vld [vmem:[%s1283_s29 + $0x10] sm:$0xff] }
  0x10   : > { %v572_v9 = vld [vmem:[%s1283_s29 + $0x2] sm:$0xff]  ;;  %1063 = vmatmul.msk.bf16.vlgmr.msra.gmra.mxu1 %vm542_vm1, %v1122_v6  ;;  %v484_v10 = vpack.c.bf16 %v480_v7, %v480_v7  ;;  %v485_v11 = vpack.c.bf16 %v481_v8, %v481_v8  ;;  %v573_v12 = vld [vmem:[%s1283_s29 + $0xa] sm:$0xff]  ;;  %v483_v29 = vld [vmem:[%s1283_s29 + $0x18] sm:$0xff]  ;;  %v486_v34 = vpack.c.bf16 %v482_v28, %v482_v28 }
  0x11   : > { %758 = vmatpush.bf16.msrb.mxu1 %v1130_v5  ;;  %v576_v13 = vpack.c.bf16 %v572_v9, %v572_v9  ;;  %v1292_v14 = vld [vmem:[%s1283_s29 + $0x4] sm:$0xff]  ;;  %v1295_v15 = vld [vmem:[%s1283_s29 + $0xc] sm:$0xff]  ;;  %v577_v16 = vpack.c.bf16 %v573_v12, %v573_v12  ;;  %v575_v31 = vld [vmem:[%s1283_s29 + $0x1a] sm:$0xff]  ;;  %v487_v35 = vpack.c.bf16 %v483_v29, %v483_v29  ;;  %719 = vmatpush.bf16.msrb.mxu0 %v1128_v51 }
  0x12   : > { %v632_v17 = vpack.c.bf16 %v1292_v14, %v1292_v14  ;;  %v633_v18 = vpack.c.bf16 %v1295_v15, %v1295_v15  ;;  %v494_v19 = vunpack.c.l.b16 %v484_v10  ;;  %v495_v20 = vunpack.c.l.b16 %v485_v11  ;;  %v574_v30 = vld [vmem:[%s1283_s29 + $0x12] sm:$0xff]  ;;  %v1312_v33 = vld [vmem:[%s1283_s29 + $0x1c] sm:$0xff] }
  0x13   : > { %v587_v21 = vunpack.c.l.b16 %v576_v13  ;;  %v588_v22 = vunpack.c.l.b16 %v577_v16  ;;  %v1309_v32 = vld [vmem:[%s1283_s29 + $0x14] sm:$0xff]  ;;  %v578_v36 = vpack.c.bf16 %v574_v30, %v574_v30  ;;  %v579_v37 = vpack.c.bf16 %v575_v31, %v575_v31  ;;  %v1127_v52 = vld [vmem:[%s1391_s4] sm:$0xff]  ;;  %s1120_s29 = sshll.u32 %s1402_s26, 5 }
  0x14   : > { %v643_v23 = vunpack.c.l.b16 %v632_v17  ;;  %v644_v24 = vunpack.c.l.b16 %v633_v18  ;;  %v498_v25 = vpack.c.b16 %v495_v20, %v494_v19  ;;  %v634_v38 = vpack.c.bf16 %v1309_v32, %v1309_v32  ;;  %s473_s19 = scalar_lea.vmem %s1400_s13, %s1120_s29  ;;  %s468_s26 = scalar_lea.vmem %s1399_s12, %s1120_s29 }
  0x15   : > { %v591_v26 = vpack.c.b16 %v588_v22, %v587_v21  ;;  %v635_v39 = vpack.c.bf16 %v1312_v33, %v1312_v33  ;;  %v496_v41 = vunpack.c.l.b16 %v486_v34  ;;  %v497_v42 = vunpack.c.l.b16 %v487_v35  ;;  %759 = vmatpush.bf16.msrb.mxu1 %v1129_v50  ;;  %720 = vmatpush.bf16.msrb.mxu0 %v1127_v52  ;;  %v1143_v21 = vld [vmem:[%s1394_s7] ss:$0 sm:$0xff] }
  0x16   : > { %v647_v27 = vpack.c.b16 %v644_v24, %v643_v23  ;;  %1053 = vmatmul.msk.bf16.vlgmr.msra.gmra.mxu0 %vm506_vm2, %v498_v25  ;;  %v589_v43 = vunpack.c.l.b16 %v578_v36  ;;  %v590_v44 = vunpack.c.l.b16 %v579_v37  ;;  %v645_v45 = vunpack.c.l.b16 %v634_v38  ;;  %v1132_v24 = vld [vmem:[%s1397_s10] sm:$0xff] }
  0x17   : > { %1071 = vmatmul.msk.bf16.vlgmr.msra.gmra.mxu2 %vm506_vm2, %v591_v26  ;;  %v646_v46 = vunpack.c.l.b16 %v635_v39  ;;  %v499_v47 = vpack.c.b16 %v497_v42, %v496_v41  ;;  %v1131_v25 = vld [vmem:[%s1395_s8] sm:$0xff]  ;;  %913 = vmatpush.bf16.msrb.mxu3 %v1132_v24 }
  0x18   : > { %1079 = vmatmul.msk.bf16.vlgmr.msra.gmra.mxu3 %vm506_vm2, %v647_v27  ;;  %v592_v48 = vpack.c.b16 %v590_v44, %v589_v43  ;;  %882 = vmatpush.bf16.msrb.mxu2 %v1131_v25  ;;  %v1142_v43 = vld [vmem:[%s1392_s5] ss:$0 sm:$0xff] }
  0x19   : > { %v648_v49 = vpack.c.b16 %v646_v46, %v645_v45 }
  0x20   : > { %1064 = vmatmul.msk.bf16.gmra.mxu1 %vm542_vm1, %v1123_v40 }
  0x26   : > { %1054 = vmatmul.msk.bf16.gmra.mxu0 %vm506_vm2, %v499_v47 }
  0x27   : > { %1072 = vmatmul.msk.bf16.gmra.mxu2 %vm506_vm2, %v592_v48 }
  0x28   : > { %1080 = vmatmul.msk.bf16.gmra.mxu3 %vm506_vm2, %v648_v49 }
  0x8d   : > { %v562_v53 = vpop.f32.mrf.mxu1 }
  0x93   : > { %v522_v54 = vpop.f32.mrf.mxu0 }
  0x94   : > { %v563_v59 = vadd.f32 %v562_v53, %v522_v54 }
  0x95   : > { %v564_v58 = vpop.f32.mrf.mxu1 }
  0x9a   : > { %v614_v55 = vpop.f32.mrf.mxu2 }
  0x9b   : > { %v670_v56 = vpop.f32.mrf.mxu3  ;;  %v524_v57 = vpop.f32.mrf.mxu0  ;;  %v624_v60 = vadd.f32 %v614_v55, %v563_v59 }
  0x9c   : > { %v565_v61 = vadd.f32 %v564_v58, %v524_v57 }
  0x9d   : > { %v680_v2 = vadd.f32 %v670_v56, %v624_v60  ;;  %v567_v4 = vpop.f32.mrf.mxu1 }
  0xa2   : > { %v616_v62 = vpop.f32.mrf.mxu2 }
  0xa3   : > { %v672_v63 = vpop.f32.mrf.mxu3  ;;  %v625_v0 = vadd.f32 %v616_v62, %v565_v61  ;;  %v527_v1 = vpop.f32.mrf.mxu0 }
  0xa4   : > { %v568_v8 = vadd.f32 %v567_v4, %v527_v1 }
  0xa5   : > { %v681_v3 = vadd.f32 %v672_v63, %v625_v0  ;;  %v569_v10 = vpop.f32.mrf.mxu1 }
  0xa7   : > { %v684_v5 = vpack.c.bf16 %v681_v3, %v680_v2 }
  0xa9   : > { %1089 = vmatmul.msk.bf16.vlgmr.msrb.gmra.mxu0 %vm706_vm3, %v684_v5  ;;  %1099 = vmatmul.msk.bf16.vlgmr.msrb.gmra.mxu1 %vm706_vm3, %v684_v5 }
  0xaa   : > { %v619_v6 = vpop.f32.mrf.mxu2 }
  0xab   : > { %v675_v7 = vpop.f32.mrf.mxu3  ;;  %v529_v9 = vpop.f32.mrf.mxu0  ;;  %v626_v11 = vadd.f32 %v619_v6, %v568_v8 }
  0xac   : > { %v570_v12 = vadd.f32 %v569_v10, %v529_v9 }
  0xad   : > { %v682_v18 = vadd.f32 %v675_v7, %v626_v11 }
  0xb2   : > { %v621_v13 = vpop.f32.mrf.mxu2 }
  0xb3   : > { %v627_v16 = vadd.f32 %v621_v13, %v570_v12  ;;  %v677_v17 = vpop.f32.mrf.mxu3 }
  0xb5   : > { %v683_v19 = vadd.f32 %v677_v17, %v627_v16 }
  0xb7   : > { %v685_v20 = vpack.c.bf16 %v683_v19, %v682_v18 }
  0xb9   : > { %1090 = vmatmul.msk.bf16.gmra.mxu0 %vm706_vm3, %v685_v20  ;;  %1100 = vmatmul.msk.bf16.gmra.mxu1 %vm706_vm3, %v685_v20 }
 0x126   : > { %v761_v22 = vpop.f32.mrf.mxu1  ;;  %v722_v30 = vpop.f32.mrf.mxu0 }
 0x127   : > { %v762_v23 = vadd.f32 %v1143_v21, %v761_v22  ;;  %v723_v49 = vadd.f32 %v1142_v43, %v722_v30 }
 0x129   : > { %v1101_v26 = vmul.f32 -1.442695, %v762_v23 }
 0x12b   : > { %1146 = vpow2.f32 %v1101_v26 }
 0x12e   : > { %v763_v27 = vpop.f32.mrf.mxu1  ;;  %v724_v42 = vpop.f32.mrf.mxu0 }
 0x12f   : > { %v764_v28 = vadd.f32 %v1143_v21, %v763_v27  ;;  %v725_v52 = vadd.f32 %v1142_v43, %v724_v42 }
 0x131   : > { %v1147_v29 = vpop.eup %1146  ;;  %v1102_v31 = vmul.f32 -1.442695, %v764_v28 }
 0x132   : > { %v787_v34 = vadd.f32 1.0, %v1147_v29 }
 0x133   : > { %1148 = vpow2.f32 %v1102_v31 }
 0x134   : > { %1150 = vrcp.f32 %v787_v34  ;;  %v802_v56 = vand.u32 2147483648, %v787_v34  ;;  %vm796_vm5 = vweird.f32 %v787_v34  ;;  %v800_v59 = vand.u32 2147483647, %v787_v34 }
 0x136   : > { %v766_v35 = vpop.f32.mrf.mxu1  ;;  %v727_v58 = vpop.f32.mrf.mxu0  ;;  %v803_v0 = vor.u32 1.1754944e-38, %v802_v56  ;;  %vm801_vm9 = vcmp.eq.f32.partialorder %v800_v59, 8.507059e+37 }
 0x137   : > { %v767_v36 = vadd.f32 %v1143_v21, %v766_v35  ;;  %v728_v20 = vadd.f32 %v1142_v43, %v727_v58 }
 0x139   : > { %v1149_v37 = vpop.eup %1148  ;;  %v1103_v38 = vmul.f32 -1.442695, %v767_v36 }
 0x13a   : > { %v1151_v39 = vpop.eup %1150  ;;  %v788_v40 = vadd.f32 1.0, %v1149_v37 }
 0x13b   : > { %v792_v41 = vmul.f32 %v1151_v39, %v787_v34  ;;  %1152 = vpow2.f32 %v1103_v38  ;;  %vm797_vm4 = vweird.f32 %v1151_v39 }
 0x13c   : > { %1154 = vrcp.f32 %v788_v40  ;;  %vm798_vm6 = vmor %vm796_vm5, %vm797_vm4  ;;  %v817_v60 = vand.u32 2147483648, %v788_v40  ;;  %v815_v63 = vand.u32 2147483647, %v788_v40  ;;  %vm811_vm8 = vweird.f32 %v788_v40 }
 0x13d   : > { %v793_v44 = vsub.f32 1.0, %v792_v41 }
 0x13e   : > { %v768_v45 = vpop.f32.mrf.mxu1  ;;  %v818_v6 = vor.u32 1.1754944e-38, %v817_v60  ;;  %vm816_vm11 = vcmp.eq.f32.partialorder %v815_v63, 8.507059e+37  ;;  %v729_v17 = vpop.f32.mrf.mxu0 }
 0x13f   : > { %v794_v46 = vmul.f32 %v1151_v39, %v793_v44  ;;  %v769_v47 = vadd.f32 %v1143_v21, %v768_v45  ;;  %v730_v22 = vadd.f32 %v1142_v43, %v729_v17  ;;  %v1144_v45 = vld [vmem:[%s1396_s9] ss:$0 sm:$0xff] }
 0x141   : > { %v1153_v48 = vpop.eup %1152  ;;  %v1104_v50 = vmul.f32 -1.442695, %v769_v47  ;;  %v795_v55 = vadd.f32 %v1151_v39, %v794_v46  ;;  %v1145_v46 = vld [vmem:[%s1398_s11] ss:$0 sm:$0xff] }
 0x142   : > { %v1155_v51 = vpop.eup %1154  ;;  %v1348_v53 = vadd.f32 1.0, %v1153_v48 }
 0x143   : > { %v807_v54 = vmul.f32 %v1155_v51, %v788_v40  ;;  %1156 = vpow2.f32 %v1104_v50  ;;  %v799_v62 = vsel %vm798_vm6, %v1151_v39, %v795_v55  ;;  %vm812_vm7 = vweird.f32 %v1155_v51 }
 0x144   : > { %1158 = vrcp.f32 %v1348_v53  ;;  %v804_v5 = vsel %vm801_vm9, %v803_v0, %v799_v62  ;;  %vm813_vm10 = vmor %vm811_vm8, %vm812_vm7  ;;  %v832_v25 = vand.u32 2147483648, %v1348_v53  ;;  %vm826_vm13 = vweird.f32 %v1348_v53 }
 0x145   : > { %1160 = vtanh.f32 %v723_v49  ;;  %v808_v57 = vsub.f32 1.0, %v807_v54  ;;  %v830_v27 = vand.u32 2147483647, %v1348_v53 }
 0x146   : > { %1162 = vtanh.f32 %v725_v52  ;;  %v833_v34 = vor.u32 1.1754944e-38, %v832_v25 }
 0x147   : > { %v809_v61 = vmul.f32 %v1155_v51, %v808_v57  ;;  %vm831_vm0 = vcmp.eq.f32.partialorder %v830_v27, 8.507059e+37 }
 0x149   : > { %v1157_v1 = vpop.eup %1156  ;;  %v810_v2 = vadd.f32 %v1155_v51, %v809_v61 }
 0x14a   : > { %v1159_v3 = vpop.eup %1158  ;;  %v790_v4 = vadd.f32 1.0, %v1157_v1 }
 0x14b   : > { %v1161_v7 = vpop.eup %1160  ;;  %v822_v8 = vmul.f32 %v1159_v3, %v1348_v53  ;;  %v814_v9 = vsel %vm813_vm10, %v1155_v51, %v810_v2  ;;  %vm827_vm12 = vweird.f32 %v1159_v3 }
 0x14c   : > { %v1163_v10 = vpop.eup %1162  ;;  %1164 = vrcp.f32 %v790_v4  ;;  %v819_v11 = vsel %vm816_vm11, %v818_v6, %v814_v9  ;;  %v851_v13 = vmul.f32 %v1161_v7, %v804_v5  ;;  %vm828_vm14 = vmor %vm826_vm13, %vm827_vm12  ;;  %v847_v28 = vand.u32 2147483648, %v790_v4 }
 0x14d   : > { %v823_v12 = vsub.f32 1.0, %v822_v8  ;;  %v852_v16 = vmul.f32 %v1163_v10, %v819_v11  ;;  %1166 = vtanh.f32 %v728_v20  ;;  %v845_v31 = vand.u32 2147483647, %v790_v4 }
 0x14e   : > { %1168 = vtanh.f32 %v730_v22  ;;  %vm841_vm1 = vweird.f32 %v790_v4  ;;  %v848_v37 = vor.u32 1.1754944e-38, %v847_v28 }
 0x14f   : > { %v855_v18 = vpack.c.bf16 %v852_v16, %v851_v13  ;;  %v824_v19 = vmul.f32 %v1159_v3, %v823_v12  ;;  %vm846_vm4 = vcmp.eq.f32.partialorder %v845_v31, 8.507059e+37 }
 0x151   : > { %1109 = vmatmul.msk.bf16.vlgmr.msrb.gmra.mxu2 %vm506_vm2, %v855_v18  ;;  %1115 = vmatmul.msk.bf16.vlgmr.msrb.gmra.mxu3 %vm506_vm2, %v855_v18  ;;  %v825_v24 = vadd.f32 %v1159_v3, %v824_v19 }
 0x152   : > { %v1165_v21 = vpop.eup %1164 }
 0x153   : > { %v837_v23 = vmul.f32 %v1165_v21, %v790_v4  ;;  %v829_v29 = vsel %vm828_vm14, %v1159_v3, %v825_v24  ;;  %vm842_vm15 = vweird.f32 %v1165_v21  ;;  %v1167_v38 = vpop.eup %1166 }
 0x154   : > { %v834_v36 = vsel %vm831_vm0, %v833_v34, %v829_v29  ;;  %vm843_vm3 = vmor %vm841_vm1, %vm842_vm15  ;;  %v1169_v40 = vpop.eup %1168 }
 0x155   : > { %v838_v26 = vsub.f32 1.0, %v837_v23  ;;  %v853_v42 = vmul.f32 %v1167_v38, %v834_v36 }
 0x157   : > { %v839_v30 = vmul.f32 %v1165_v21, %v838_v26 }
 0x159   : > { %v840_v35 = vadd.f32 %v1165_v21, %v839_v30 }
 0x15b   : > { %v844_v39 = vsel %vm843_vm3, %v1165_v21, %v840_v35 }
 0x15c   : > { %v849_v41 = vsel %vm846_vm4, %v848_v37, %v844_v39 }
 0x15d   : > { %v854_v43 = vmul.f32 %v1169_v40, %v849_v41 }
 0x15f   : > { %v856_v44 = vpack.c.bf16 %v854_v43, %v853_v42 }
 0x161   : > { %1110 = vmatmul.msk.bf16.gmra.mxu2 %vm506_vm2, %v856_v44  ;;  %1116 = vmatmul.msk.bf16.gmra.mxu3 %vm506_vm2, %v856_v44 }
 0x1d4   : > { %v884_v47 = vpop.f32.mrf.mxu2  ;;  %v915_v48 = vpop.f32.mrf.mxu3 }
 0x1d5   : > { %v885_v49 = vadd.f32 %v1144_v45, %v884_v47  ;;  %v916_v50 = vadd.f32 %v1145_v46, %v915_v48 }
 0x1d7   : > { %933 = vst.msk [vmem:[%s473_s19] sm:$0xff] %vm506_vm2, %v885_v49  ;;  %v925_v51 = vadd.f32 %v916_v50, %v1292_v14 }
 0x1d9   : > { %929 = vst.msk [vmem:[%s468_s26] sm:$0xff] %vm506_vm2, %v925_v51 }
 0x1dc   : > { %v886_v52 = vpop.f32.mrf.mxu2  ;;  %v917_v53 = vpop.f32.mrf.mxu3 }
 0x1dd   : > { %v887_v54 = vadd.f32 %v1144_v45, %v886_v52  ;;  %v918_v55 = vadd.f32 %v1145_v46, %v917_v53 }
 0x1df   : > { %934 = vst.msk [vmem:[%s473_s19 + $0x8] sm:$0xff] %vm506_vm2, %v887_v54  ;;  %v926_v56 = vadd.f32 %v918_v55, %v1295_v15 }
 0x1e1   : > { %930 = vst.msk [vmem:[%s468_s26 + $0x8] sm:$0xff] %vm506_vm2, %v926_v56 }
 0x1e4   : > { %v889_v57 = vpop.f32.mrf.mxu2  ;;  %v920_v58 = vpop.f32.mrf.mxu3 }
 0x1e5   : > { %v890_v59 = vadd.f32 %v1144_v45, %v889_v57  ;;  %v921_v60 = vadd.f32 %v1145_v46, %v920_v58 }
 0x1e7   : > { %935 = vst.msk [vmem:[%s473_s19 + $0x10] sm:$0xff] %vm506_vm2, %v890_v59  ;;  %v927_v14 = vadd.f32 %v921_v60, %v1309_v32 }
 0x1e9   : > { %931 = vst.msk [vmem:[%s468_s26 + $0x10] sm:$0xff] %vm506_vm2, %v927_v14 }
 0x1ec   : > { %v891_v61 = vpop.f32.mrf.mxu2  ;;  %v922_v62 = vpop.f32.mrf.mxu3 }
 0x1ed   : > { %v892_v63 = vadd.f32 %v1144_v45, %v891_v61  ;;  %v923_v0 = vadd.f32 %v1145_v46, %v922_v62 }
 0x1ef   : > { %936 = vst.msk [vmem:[%s473_s19 + $0x18] sm:$0xff] %vm506_vm2, %v892_v63  ;;  %v928_v15 = vadd.f32 %v923_v0, %v1312_v33 }
 0x1f1   : > { %932 = vst.msk [vmem:[%s468_s26 + $0x18] sm:$0xff] %vm506_vm2, %v928_v15 }
 0x1f2 PF: > { %s24_s25 = sadd.s32 1, %s1176_s25  }
 0x1f3   : > { %p21_p4 = scmp.ge.s32.totalorder %s24_s25, 4  }
 0x1f5   :  { %23 = sbr.rel (!%p21_p4) target bundleno = 1 (0x1), region = 115 }

</bundles_post_ra>
